<compile_context>
chip_gen: v7x
topology: tpu7x:2x2x1
jax: 0.10.0
libtpu: 0.0.40
codegen_flags: <defaults>
</compile_context>

<pallas_src>
import functools
import math

import jax
import jax.numpy as jnp
from jax.experimental import pallas as pl
from jax.experimental.pallas import tpu as pltpu


def _build_pe(max_len: int, d_model: int, dtype=jnp.float32) -> jnp.ndarray:
    """sin/cos positional-encoding table, shape (max_len, d_model).

    Same math as the PyTorch buffer (which is (max_len, 1, d_model)); the batch
    broadcast is done inside the kernel so the table is kept 2-D.  Handles odd
    d_model (cos fills only floor(d_model/2) columns).
    """
    position = jnp.arange(max_len, dtype=jnp.float32)[:, None]            # (max_len, 1)
    div_term = jnp.exp(
        jnp.arange(0, d_model, 2, dtype=jnp.float32) * (-math.log(10000.0) / d_model)
    )                                                                      # (ceil(d/2),)
    angles = position * div_term                                           # (max_len, ceil(d/2))
    pe = jnp.zeros((max_len, d_model), dtype=jnp.float32)
    pe = pe.at[:, 0::2].set(jnp.sin(angles))
    pe = pe.at[:, 1::2].set(jnp.cos(angles)[:, : d_model // 2])
    return pe.astype(dtype)


def _pos_enc_kernel_3d(x_ref, pe_ref, o_ref):
    # x_ref / o_ref: (ts, B, tc); pe_ref: (ts, 1, tc) -> broadcast over the batch
    # (sublane) axis inside the same tile structure.
    o_ref[...] = x_ref[...] + pe_ref[...]


def _pos_enc_kernel_flat(x_ref, pe_ref, o_ref, *, batch, d_model):
    # x_ref / o_ref: (ts, B*D) dense tiles; pe_ref: (ts, D).
    # Only used when batch < sublane pack, so the static unroll is tiny; slices
    # are lane-aligned whenever d_model is a multiple of 128 (typical).
    pe = pe_ref[...]
    for b in range(batch):
        lo = b * d_model
        o_ref[:, lo:lo + d_model] = x_ref[:, lo:lo + d_model] + pe


def _choose_tiles(S, B, D, itemsize, budget_bytes):
    """Pick (seq_tile, lane_tile, flatten).

    flatten=True -> treat x as (S, B*D) (dense sublane/lane tiles for small B).
    The per-step double-buffered working set (x + out + pe tiles) stays under
    budget_bytes; d_model is only split in the fallback where even a single
    sequence row is too large.
    """
    sub = max(8, 32 // max(1, itemsize))     # sublane pack: f32 -> 8, bf16 -> 16, int8 -> 32
    lane = 128

    # Bytes per sequence row, double-buffered: x row + out row (B*D each) + pe row (D).
    row_bytes = 2 * (2 * B * D + D) * itemsize

    if row_bytes > budget_bytes:
        # Fallback: a single full-width row exceeds the budget -> 3-D layout with a
        # 128-multiple lane split of d_model (strided DMA, but bounded VMEM).
        if D <= lane:
            return 1, D, False
        tc = (budget_bytes // (2 * (2 * B + 1) * itemsize) // lane) * lane
        tc = int(max(lane, min(tc, D)))
        return 1, tc, False

    flatten = B < sub          # small batch: avoid sublane under-fill / padded tiles
    tc = D                     # full d_model -> every block is a contiguous HBM region

    ts = max(1, budget_bytes // row_bytes)
    ts = min(ts, S)
    if S >= sub:
        ts = max(sub, (ts // sub) * sub)     # keep blocks sublane-aligned
    else:
        ts = S                               # tiny sequence: full-extent block

    # Prefer >= 2 grid steps along the (parallel) seq axis so prefetch/writeback
    # overlaps the add and both v7x TensorCores get work.
    if ts == S and S >= 2 * sub:
        ts = max(sub, ((S // 2) // sub) * sub)
    return ts, tc, flatten


def positional_encoding(
    x: jnp.ndarray,
    pe_full: jnp.ndarray,
    *,
    seq_tile: int | None = None,
    vmem_budget_bytes: int = 20 * 1024 * 1024,
    donate_x: bool = False,
):
    """x: (S, B, D); pe_full: (max_len, D) or PyTorch-style (max_len, 1, D).

    Returns x + pe_full[:S] (broadcast over batch), same dtype/shape as x.
    """
    S, B, D = x.shape
    pe = pe_full[:S]
    if pe.ndim == 3:                  # accept the (max_len, 1, d_model) buffer layout
        pe = pe[:, 0, :]
    # NOTE: pe is cast to x.dtype (PyTorch keeps the buffer f32 and promotes in the
    # add); bf16 inputs may differ from torch by ~1 bf16 ulp.  Halves pe DMA for bf16.
    pe = pe.astype(x.dtype)

    itemsize = jnp.dtype(x.dtype).itemsize
    ts, tc, flatten = _choose_tiles(S, B, D, itemsize, vmem_budget_bytes)
    if seq_tile is not None:
        ts = seq_tile

    extra = {}
    if donate_x:
        # Only safe/beneficial if the caller actually donates x at the jit boundary.
        extra["input_output_aliases"] = {0: 0}

    cparams = pltpu.CompilerParams(
        dimension_semantics=("parallel",) if flatten else ("parallel", "parallel"),
        vmem_limit_bytes=32 * 1024 * 1024,
    )

    if flatten:
        # Free reshape: x is contiguous (S, B, D), so (S, B*D) is the same bytes.
        x2d = x.reshape(S, B * D)
        kernel = functools.partial(_pos_enc_kernel_flat, batch=B, d_model=D)
        out2d = pl.pallas_call(
            kernel,
            out_shape=jax.ShapeDtypeStruct((S, B * D), x.dtype),
            grid_spec=pltpu.PrefetchScalarGridSpec(
                num_scalar_prefetch=0,
                grid=(pl.cdiv(S, ts),),                 # padded tail handled by Pallas
                in_specs=[
                    pl.BlockSpec((ts, B * D), lambda i: (i, 0)),
                    pl.BlockSpec((ts, D), lambda i: (i, 0)),
                ],
                out_specs=pl.BlockSpec((ts, B * D), lambda i: (i, 0)),
            ),
            compiler_params=cparams,
            **extra,
        )(x2d, pe)
        return out2d.reshape(S, B, D)

    pe3d = pe[:, None, :]                               # (S, 1, D)
    return pl.pallas_call(
        _pos_enc_kernel_3d,
        out_shape=jax.ShapeDtypeStruct((S, B, D), x.dtype),
        grid_spec=pltpu.PrefetchScalarGridSpec(
            num_scalar_prefetch=0,
            grid=(pl.cdiv(S, ts), pl.cdiv(D, tc)),      # lane grid is 1 unless fallback split
            in_specs=[
                pl.BlockSpec((ts, B, tc), lambda i, j: (i, 0, j)),
                pl.BlockSpec((ts, 1, tc), lambda i, j: (i, 0, j)),
            ],
            out_specs=pl.BlockSpec((ts, B, tc), lambda i, j: (i, 0, j)),
        ),
        compiler_params=cparams,
        **extra,
    )(x, pe3d)


if __name__ == "__main__":
    max_len = 5000

    # Shapes use the module's (seq_len, batch, d_model) convention.
    tests = [
        (8, 2, 32, jnp.float32),      # tiny demo: flattened small-batch path, single step
        (192, 8, 128, jnp.float32),   # 3-D path (B == sublane pack), 2 seq steps
        (100, 4, 256, jnp.float32),   # flattened path, seq not divisible -> padded tail block
        (64, 16, 128, jnp.bfloat16),  # bf16 3-D path (sublane pack = 16)
    ]

    key = jax.random.PRNGKey(0)
    for (S, B, D, dt) in tests:
        key, sub_key = jax.random.split(key)
        x = jax.random.normal(sub_key, (S, B, D), dtype=jnp.float32).astype(dt)
        pe_full = _build_pe(max_len, D, dtype=dt)

        out = jax.block_until_ready(positional_encoding(x, pe_full))

        # Reference in plain JAX (same math as the PyTorch module, same dtype policy).
        ref = x + pe_full[:S][:, None, :]
        assert out.shape == x.shape and out.dtype == x.dtype
        tol = 1e-6 if dt == jnp.float32 else 2e-2
        assert jnp.allclose(out.astype(jnp.float32), ref.astype(jnp.float32), atol=tol), (
            f"mismatch vs reference for {(S, B, D, dt)}"
        )

    print("KERNEL_OK")
</pallas_src>

<mosaic_0001>
module attributes {stable_mosaic.version = 11 : i64} {
  func.func @_pos_enc_kernel_flat(%arg0: i32, %arg1: memref<8x64xf32, #tpu.memory_space<vmem>>, %arg2: memref<8x32xf32, #tpu.memory_space<vmem>>, %arg3: memref<8x64xf32, #tpu.memory_space<vmem>>) attributes {dimension_semantics = [#tpu.dimension_semantics<parallel>], iteration_bounds = array<i64: 1>, scalar_prefetch = 0 : i64, scratch_operands = 0 : i64, tpu.core_type = #tpu.core_type<tc>, window_params = [{transform_indices = @transform_0, window_bounds = array<i64: 8, 64>}, {transform_indices = @transform_1, window_bounds = array<i64: 8, 32>}, {transform_indices = @transform_2, window_bounds = array<i64: 8, 64>}]} {
    %c0 = arith.constant 0 : index
    %c0_0 = arith.constant 0 : index
    %0 = vector.load %arg2[%c0, %c0_0] : memref<8x32xf32, #tpu.memory_space<vmem>>, vector<8x32xf32>
    %c0_1 = arith.constant 0 : index
    %c0_2 = arith.constant 0 : index
    %1 = vector.load %arg1[%c0_1, %c0_2] : memref<8x64xf32, #tpu.memory_space<vmem>>, vector<8x32xf32>
    %2 = arith.addf %1, %0 : vector<8x32xf32>
    %c0_3 = arith.constant 0 : index
    %c0_4 = arith.constant 0 : index
    %3 = vector.load %arg3[%c0_3, %c0_4] : memref<8x64xf32, #tpu.memory_space<vmem>>, vector<8x32xf32>
    tpu.vector_store %arg3[%c0_3, %c0_4], %2 {strides = array<i32>} : memref<8x64xf32, #tpu.memory_space<vmem>>, vector<8x32xf32>,
    %c0_5 = arith.constant 0 : index
    %c32 = arith.constant 32 : index
    %4 = vector.load %arg1[%c0_5, %c32] : memref<8x64xf32, #tpu.memory_space<vmem>>, vector<8x32xf32>
    %5 = arith.addf %4, %0 : vector<8x32xf32>
    %c0_6 = arith.constant 0 : index
    %c32_7 = arith.constant 32 : index
    %6 = vector.load %arg3[%c0_6, %c32_7] : memref<8x64xf32, #tpu.memory_space<vmem>>, vector<8x32xf32>
    tpu.vector_store %arg3[%c0_6, %c32_7], %5 {strides = array<i32>} : memref<8x64xf32, #tpu.memory_space<vmem>>, vector<8x32xf32>,
    return
  }
  func.func @transform_0(%arg0: i32) -> (i32, i32) {
    %c0_i32 = arith.constant 0 : i32
    %c0_i32_0 = arith.constant 0 : i32
    return %arg0, %c0_i32 : i32, i32
  }
  func.func @transform_1(%arg0: i32) -> (i32, i32) {
    %c0_i32 = arith.constant 0 : i32
    %c0_i32_0 = arith.constant 0 : i32
    return %arg0, %c0_i32 : i32, i32
  }
  func.func @transform_2(%arg0: i32) -> (i32, i32) {
    %c0_i32 = arith.constant 0 : i32
    %c0_i32_0 = arith.constant 0 : i32
    return %arg0, %c0_i32 : i32, i32
  }
}

</mosaic_0001>

<bundles_post_ra>
// kernel: tpu_custom_call.1
= control target key start
LH: loop header
LB: loop body
LE: loop exit
PB: predicated region body
PF: predicated region fallthrough
CT: control target
= control target key end

     0   :  { %7 = vsyncpa [#allocation3], 0  ;;  %s196_s0 = inlined_call_operand.hbm [shape: f32[8,64], index: 0, kind: input, shape index: {}]   ;;  %s197_s1 = inlined_call_operand.hbm [shape: f32[8,32], index: 1, kind: input, shape index: {}]   ;;  %s198_s2 = inlined_call_operand.hbm [shape: f32[8,64], index: 2, kind: output, shape index: {}]  }
   0x1   :  { %8 = vsyncpa [#allocation6], 0 }
   0x2   :  { %9 = vsyncpa [#allocation4], 0  ;;  %s141_s9 = smov [#allocation2]   ;;  %s142_s11 = smov [#allocation5]  }
   0x3   :  { %s16_s10 = sshll.u32 %s141_s9, 4  ;;  %s26_s12 = sshll.u32 %s142_s11, 4  ;;  %s17_s10 = int_to_ptr.vmem [resolvable:$true] %s16_s10  ;;  %s27_s12 = int_to_ptr.vmem [resolvable:$true] %s26_s12 }
   0x4   :  { %s69_s15 = scalar_lea.hbm %s196_s0, 128 }
   0x5   :  { %p70_p0 = scmp.ne.s32.totalorder %s196_s0, %s69_s15  ;;  %p73_p1 = scmp.lt.u32.totalorder %s69_s15, %s196_s0 }
   0x7   :  { %p75_p2 = pnand %p73_p1, %p70_p0 }
   0x9   :  { %78 = shalt.err (!%p75_p2)
}
   0xa   :  { %s79_s20 = scalar_lea.vmem %s17_s10, 128  ;;  %p84_p4 = scmp.lt.s32.totalorder %s17_s10, %s17_s10 }
   0xb   :  { %p80_p3 = scmp.ne.s32.totalorder %s17_s10, %s79_s20  ;;  %p85_p5 = scmp.lt.s32.totalorder %s79_s20, %s79_s20 }
   0xd   :  { %p86_p6 = por %p85_p5, %p84_p4 }
   0xf   :  { %p87_p7 = pnand %p86_p6, %p80_p3 }
  0x11   :  { %90 = shalt.err (!%p87_p7)
}
  0x12   :  { %19 = dma.hbm_to_vmem [thread:$0]  %s196_s0, 128, %s17_s10, [#allocation3]  }
  0x13   :  { %s91_s25 = scalar_lea.hbm %s197_s1, 128 }
  0x14   :  { %p92_p8 = scmp.ne.s32.totalorder %s197_s1, %s91_s25  ;;  %p95_p9 = scmp.lt.u32.totalorder %s91_s25, %s197_s1 }
  0x16   :  { %p97_p10 = pnand %p95_p9, %p92_p8 }
  0x18   :  { %100 = shalt.err (!%p97_p10)
}
  0x19   :  { %s101_s30 = scalar_lea.vmem %s27_s12, 128  ;;  %p106_p12 = scmp.lt.s32.totalorder %s27_s12, %s27_s12 }
  0x1a   :  { %p102_p11 = scmp.ne.s32.totalorder %s27_s12, %s101_s30  ;;  %p107_p13 = scmp.lt.s32.totalorder %s101_s30, %s101_s30 }
  0x1c   :  { %p108_p0 = por %p107_p13, %p106_p12 }
  0x1e   :  { %p109_p1 = pnand %p108_p0, %p102_p11 }
  0x20   :  { %112 = shalt.err (!%p109_p1)
}
  0x21   :  { %29 = dma.hbm_to_vmem [thread:$0]  %s197_s1, 128, %s27_s12, [#allocation6]  }
  0x22   :  { %135 = dma.done.wait [#allocation3], 128  }
  0x23   :  { %136 = vsyncadd [#allocation3], 4294967168 }
  0x24   :  { %137 = dma.done.wait [#allocation6], 128  }
  0x25   :  { %138 = vsyncadd [#allocation6], 4294967168  ;;  %v36_v0 = vld [vmem:[#allocation5] sm:$0xff]  ;;  %v37_v1 = vld [vmem:[#allocation2] sm:$0xff]  ;;  %vm39_vm0 = vcmask 261120   ;;  %s143_s4 = smov 32  }
  0x26   :  { %v38_v2 = vadd.f32 %v37_v1, %v36_v0  ;;  %43 = vrot.lane.b32.xlu0 %v36_v0, %s143_s4  ;;  %s144_s5 = smov [#allocation7]   ;;  %vm47_vm1 = vcmask 523520  }
  0x27   :  { %s55_s6 = sshll.u32 %s144_s5, 4  ;;  %s56_s6 = int_to_ptr.vmem [resolvable:$true] %s55_s6 }
  0x28   :  { %40 = vst.msk [vmem:[#allocation7] sm:$0xff] %vm39_vm0, %v38_v2  ;;  %s113_s7 = scalar_lea.vmem %s56_s6, 128  ;;  %p118_p3 = scmp.lt.s32.totalorder %s56_s6, %s56_s6 }
  0x29   :  { %p114_p2 = scmp.ne.s32.totalorder %s56_s6, %s113_s7  ;;  %p119_p4 = scmp.lt.s32.totalorder %s113_s7, %s113_s7 }
  0x2b   :  { %p120_p5 = por %p119_p4, %p118_p3 }
  0x2d   :  { %p121_p6 = pnand %p120_p5, %p114_p2 }
  0x98   :  { %v44_v3 = vpop.permute.xlu0 %43 }
  0x99   :  { %v46_v4 = vadd.f32 %v44_v3, %v37_v1 }
  0x9b   :  { %48 = vst.msk [vmem:[#allocation7] sm:$0xff] %vm47_vm1, %v46_v4 }
  0x9c   :  { %124 = shalt.err (!%p121_p6)
}
  0x9d   :  { %s125_s9 = scalar_lea.hbm %s198_s2, 128 }
  0x9e   :  { %p126_p7 = scmp.ne.s32.totalorder %s198_s2, %s125_s9  ;;  %p129_p8 = scmp.lt.u32.totalorder %s125_s9, %s198_s2 }
  0xa0   :  { %p131_p9 = pnand %p129_p8, %p126_p7 }
  0xa2   :  { %134 = shalt.err (!%p131_p9)
}
  0xa3   :  { %58 = dma.vmem_to_hbm [thread:$0]  %s56_s6, 128, %s198_s2, [#allocation4]  }
  0xa4   :  { %139 = dma.done.wait [#allocation4], 128  }
  0xa5   :  { %140 = vsyncadd [#allocation4], 4294967168 }
  0xa6   :  { %62 = vsyncpa [#allocation3], 1 }
  0xa7   :  { %63 = vsyncpa [#allocation6], 1 }
  0xa8   :  { %64 = vsyncpa [#allocation4], 1 }

</bundles_post_ra>
